<compile_context>
chip_gen: v5e
topology: v5e:2x2
jax: 0.10.0
libtpu: 0.0.40
codegen_flags: <defaults>
</compile_context>

<pallas_src>
import functools
import math
from typing import List, Optional

import jax
import jax.numpy as jnp
from jax.experimental import pallas as pl
from jax.experimental.pallas import tpu as pltpu


_TARGET_ROW_TILE = 512   # large tiles -> near HBM roofline for this mem-bound op


def _vmem_budget():
    """Generation-aware scoped VMEM limit and tile-sizing budget (bytes)."""
    cap = None
    try:
        cap = getattr(pltpu.get_tpu_info(), "vmem_capacity_bytes", None)
    except Exception:
        cap = None
    if cap is None:
        cap = 64 * 1024 * 1024                     # conservative: v7x physical VMEM
    if cap >= 128 * 1024 * 1024:                   # v5e / v6e (128 MiB parts)
        return 96 * 1024 * 1024, 80 * 1024 * 1024
    return 48 * 1024 * 1024, 36 * 1024 * 1024      # v7x (64 MiB physical)


_VMEM_LIMIT_BYTES, _VMEM_BUDGET_BYTES = _vmem_budget()


def _round_up(x: int, m: int) -> int:
    return ((x + m - 1) // m) * m


def _sublane_count(dtype) -> int:
    """Packed sublane count: 8 for f32, 16 for bf16, 32 for int8/fp8."""
    return max(8, 32 // jnp.dtype(dtype).itemsize)


def _pick_row_tile(rows: int, per_row_bytes: int, sub: int = 8,
                   reserved_bytes: int = 0) -> int:
    """Largest row tile (multiple of `sub`) fitting the VMEM budget, capped at target."""
    budget = max(_VMEM_BUDGET_BYTES - reserved_bytes, sub * per_row_bytes)
    max_tr = max(sub, (budget // max(per_row_bytes, 1)) // sub * sub)
    tr = min(_round_up(_TARGET_ROW_TILE, sub), max_tr)
    if rows <= tr:
        return rows                          # single full-extent block
    return max(sub, (tr // sub) * sub)


def _mix_layout(shape, sub: int):
    """Pick a lane-dense 2D flatten (rows, C) for the purely elementwise mix."""
    total = math.prod(shape)
    for c in (2048, 1024, 512, 256, 128):
        if total % c == 0 and (total // c) % sub == 0:
            return total // c, c
    for c in (2048, 1024, 512, 256, 128):
        if total % c == 0:
            return total // c, c
    # TODO(synk): lane-sparse fallback when total has no 128 factor (odd hidden dims).
    return math.prod(shape[:-1]), shape[-1]


# --------------------------------------------------------------------------
# Pallas kernels
# --------------------------------------------------------------------------
def _mix_kernel(scale_ref, bias_ref, *refs, n):
    """out = bias + sum_k scale_k * x_k   (elementwise; scalars live in SMEM)."""
    x_refs = refs[:n]
    o_ref = refs[n]
    acc = scale_ref[0] * x_refs[0][...].astype(jnp.float32) + bias_ref[0]
    for k in range(1, n):
        acc = acc + scale_ref[k] * x_refs[k][...].astype(jnp.float32)
    o_ref[...] = acc.astype(o_ref.dtype)


def _stats_kernel(mask_ref, *refs, n, tr, rows, acc_sub):
    """Fused single pass: per tensor sum(x*m), sum((x*m)^2); plus sum(m).

    Partial sums live in persistent (n, acc_sub, d) VMEM scratch (pure VALU adds
    in the hot loop); scalar SMEM outputs are written only at the last grid step.
    A static row-validity predicate masks garbage rows of a partial last block.
    """
    x_refs = refs[:n]
    sums_ref, sqs_ref, msum_ref = refs[n], refs[n + 1], refs[n + 2]
    acc_s, acc_q, acc_m = refs[n + 3], refs[n + 4], refs[n + 5]

    @pl.when(pl.program_id(0) == 0)
    def _():
        acc_s[...] = jnp.zeros_like(acc_s)
        acc_q[...] = jnp.zeros_like(acc_q)
        acc_m[...] = jnp.zeros_like(acc_m)

    guard = (rows % tr) != 0                        # static (trace-time) bool
    m = mask_ref[...].astype(jnp.float32)           # (tr, 1)
    if guard:
        row0 = pl.program_id(0) * tr
        iota = jax.lax.broadcasted_iota(jnp.int32, (tr, 1), 0)
        valid = (row0 + iota) < rows
        m = jnp.where(valid, m, 0.0)                # kill garbage mask rows

    def _fold(v):
        # (tr, c) -> (acc_sub, c): group-of-8-sublane partial sums (VALU adds),
        # cross-sublane collapse deferred to the epilogue.
        if acc_sub == 1:
            return jnp.sum(v, axis=0, keepdims=True)
        return jnp.sum(v.reshape(tr // acc_sub, acc_sub, v.shape[-1]), axis=0)

    acc_m[...] = acc_m[...] + _fold(m)
    for k in range(n):
        xm = x_refs[k][...].astype(jnp.float32) * m   # (tr, d)
        if guard:
            xm = jnp.where(valid, xm, 0.0)            # NaN*0 safety on garbage rows
        acc_s[k] = acc_s[k] + _fold(xm)
        acc_q[k] = acc_q[k] + _fold(xm * xm)

    @pl.when(pl.program_id(0) == pl.num_programs(0) - 1)
    def _():
        msum_ref[0] = jnp.sum(acc_m[...])
        for k in range(n):
            sums_ref[k] = jnp.sum(acc_s[k])
            sqs_ref[k] = jnp.sum(acc_q[k])


# --------------------------------------------------------------------------
# pallas_call wrappers
# --------------------------------------------------------------------------
def _masked_stats(tensors2d, maskf2d):
    """tensors2d: list of (rows, d) native-dtype arrays; maskf2d: (rows, 1) f32.
    Returns (sums, sqs, msum): sum(x*m), sum((x*m)^2) per tensor, and sum(m)."""
    n = len(tensors2d)
    rows, d = tensors2d[0].shape
    in_bytes = tensors2d[0].dtype.itemsize
    sub = _sublane_count(tensors2d[0].dtype)

    # Persistent accumulator scratch is sublane/lane padded -> charge the budget.
    d_pad = _round_up(d, 128)
    scratch_bytes = 2 * n * 8 * d_pad * 4 + 8 * 128 * 4
    per_row = 2 * (n * d * in_bytes + 4)            # double-buffered inputs + mask
    tr = _pick_row_tile(rows, per_row, sub, reserved_bytes=scratch_bytes)
    acc_sub = 8 if tr % 8 == 0 else 1

    nelem = rows * d
    cost = pl.CostEstimate(
        flops=6 * n * nelem, transcendentals=0,
        bytes_accessed=n * nelem * in_bytes + rows * 4 + (2 * n + 1) * 4)

    return pl.pallas_call(
        functools.partial(_stats_kernel, n=n, tr=tr, rows=rows, acc_sub=acc_sub),
        out_shape=(jax.ShapeDtypeStruct((n,), jnp.float32),
                   jax.ShapeDtypeStruct((n,), jnp.float32),
                   jax.ShapeDtypeStruct((1,), jnp.float32)),
        grid=(pl.cdiv(rows, tr),),
        in_specs=[pl.BlockSpec((tr, 1), lambda i: (i, 0))]
                 + [pl.BlockSpec((tr, d), lambda i: (i, 0)) for _ in range(n)],
        out_specs=(pl.BlockSpec(memory_space=pltpu.MemorySpace.SMEM),
                   pl.BlockSpec(memory_space=pltpu.MemorySpace.SMEM),
                   pl.BlockSpec(memory_space=pltpu.MemorySpace.SMEM)),
        scratch_shapes=[pltpu.VMEM((n, acc_sub, d), jnp.float32),
                        pltpu.VMEM((n, acc_sub, d), jnp.float32),
                        pltpu.VMEM((acc_sub, 1), jnp.float32)],
        compiler_params=pltpu.CompilerParams(
            dimension_semantics=("arbitrary",),
            vmem_limit_bytes=_VMEM_LIMIT_BYTES),
        cost_estimate=cost,
    )(maskf2d, *tensors2d)


def _scalar_mix(tensors, scale, bias, out_dtype):
    n = len(tensors)
    shape = tensors[0].shape
    sub = _sublane_count(tensors[0].dtype)
    rows, c = _mix_layout(shape, sub)
    t2 = [t.reshape(rows, c) for t in tensors]       # free reshape (contiguous merge)
    in_bytes = t2[0].dtype.itemsize
    out_bytes = jnp.dtype(out_dtype).itemsize
    per_row = 2 * c * (n * in_bytes + out_bytes)     # double-buffered ins + out
    tr = _pick_row_tile(rows, per_row, sub)

    nelem = rows * c
    cost = pl.CostEstimate(
        flops=2 * n * nelem, transcendentals=0,
        bytes_accessed=n * nelem * in_bytes + nelem * out_bytes + (n + 1) * 4)

    out = pl.pallas_call(
        functools.partial(_mix_kernel, n=n),
        out_shape=jax.ShapeDtypeStruct((rows, c), out_dtype),
        grid=(pl.cdiv(rows, tr),),
        in_specs=[pl.BlockSpec(memory_space=pltpu.MemorySpace.SMEM),   # scale (n,)
                  pl.BlockSpec(memory_space=pltpu.MemorySpace.SMEM)]   # bias (1,)
                 + [pl.BlockSpec((tr, c), lambda i: (i, 0)) for _ in range(n)],
        out_specs=pl.BlockSpec((tr, c), lambda i: (i, 0)),
        compiler_params=pltpu.CompilerParams(
            dimension_semantics=("parallel",),       # independent rows (2 TCs on v7x)
            vmem_limit_bytes=_VMEM_LIMIT_BYTES),
        cost_estimate=cost,
    )(scale, bias, *t2)
    return out.reshape(shape)


# --------------------------------------------------------------------------
# Module (parameter setup / glue in plain JAX, hot path in Pallas)
# --------------------------------------------------------------------------
class ScalarMixWithDropout:
    def __init__(self, mixture_size: int, do_layer_norm: bool = False,
                 initial_scalar_parameters: Optional[List[float]] = None,
                 trainable: bool = True, dropout: Optional[float] = None,
                 dropout_value: float = -1e20) -> None:
        self.mixture_size = mixture_size
        self.do_layer_norm = do_layer_norm
        self.dropout = dropout
        self.dropout_value = dropout_value
        if initial_scalar_parameters is None:
            initial_scalar_parameters = [0.0] * mixture_size
        elif len(initial_scalar_parameters) != mixture_size:
            raise ValueError("Length of initial_scalar_parameters differs from mixture_size")
        self.scalar_parameters = jnp.asarray(initial_scalar_parameters, jnp.float32)
        self.gamma = jnp.asarray([1.0], jnp.float32)

    def __call__(self, tensors: List[jnp.ndarray], mask: Optional[jnp.ndarray] = None,
                 dropout_key: Optional[jax.Array] = None,
                 out_dtype=None) -> jnp.ndarray:
        if len(tensors) != self.mixture_size:
            raise ValueError("wrong number of tensors passed")

        weights = self.scalar_parameters
        if self.dropout:
            # TODO(synk): torch uses dropout_mask.uniform_() (torch RNG stream); here we use
            # jax.random — same semantics (drop weight to dropout_value pre-softmax), different bits.
            if dropout_key is None:
                dropout_key = jax.random.PRNGKey(0)
            u = jax.random.uniform(dropout_key, (self.mixture_size,))
            weights = jnp.where(u > self.dropout, weights,
                                jnp.full_like(weights, self.dropout_value))
        normed_weights = jax.nn.softmax(weights, axis=0)

        n = len(tensors)
        shape = tensors[0].shape
        d = shape[-1]
        if out_dtype is None:
            # Matches torch promotion (f32 params * input); pass bf16 explicitly to
            # halve output write traffic when inputs are bf16 (user-visible choice).
            out_dtype = jnp.promote_types(jnp.float32, tensors[0].dtype)

        if not self.do_layer_norm:
            means = jnp.zeros((n,), jnp.float32)
            istds = jnp.ones((n,), jnp.float32)
        else:
            if mask is None:
                raise ValueError("mask is required when do_layer_norm=True")
            rows = math.prod(shape[:-1])
            t2 = [t.reshape(rows, d) for t in tensors]        # free reshape, native dtype
            maskf = mask.astype(jnp.float32).reshape(rows, 1)
            sums, sqs, msum = _masked_stats(t2, maskf)
            num = msum[0] * jnp.float32(d)                    # sum(mask) * input_dim (as torch)
            means = sums / num
            # TODO(synk): single-pass E[x^2]-mean^2 assumes a 0/1 mask (m^2 == m) and can lose
            # precision for very-large-mean activations vs. the two-pass torch formulation.
            variances = jnp.maximum(sqs / num - means * means, 0.0)
            istds = 1.0 / jnp.sqrt(variances + 1e-12)

        gamma = self.gamma[0]
        scale = (gamma * normed_weights * istds).astype(jnp.float32)                     # (n,)
        bias = (-gamma * jnp.sum(normed_weights * means * istds)).reshape(1).astype(jnp.float32)
        return _scalar_mix(list(tensors), scale, bias, out_dtype)


# --------------------------------------------------------------------------
# Pure-JAX reference (mirrors the PyTorch forward)
# --------------------------------------------------------------------------
def reference_forward(tensors, scalar_parameters, gamma, do_layer_norm, mask):
    normed = jax.nn.softmax(scalar_parameters, axis=0)
    if not do_layer_norm:
        out = sum(normed[k] * tensors[k] for k in range(len(tensors)))
        return gamma[0] * out
    maskf = mask.astype(jnp.float32)
    bm = maskf[..., None]
    d = tensors[0].shape[-1]
    num = jnp.sum(maskf) * d
    pieces = []
    for k, t in enumerate(tensors):
        tm = t * bm
        mean = jnp.sum(tm) / num
        var = jnp.sum(((tm - mean) * bm) ** 2) / num
        pieces.append(normed[k] * (t - mean) / jnp.sqrt(var + 1e-12))
    return gamma[0] * sum(pieces)


# --------------------------------------------------------------------------
if __name__ == "__main__":
    key = jax.random.PRNGKey(0)
    N = 4
    keys = jax.random.split(key, 2 * N + 2)
    init = [0.1 * i for i in range(N)]

    # Path 1: default (do_layer_norm=False, dropout=None), small shape.
    B, T, D = 2, 8, 32
    tensors = [jax.random.normal(keys[i], (B, T, D), jnp.float32) for i in range(N)]
    mix = ScalarMixWithDropout(N, initial_scalar_parameters=init)
    out = mix(tensors)
    jax.block_until_ready(out)
    ref = reference_forward(tensors, mix.scalar_parameters, mix.gamma, False, None)
    assert out.shape == (B, T, D) and out.dtype == jnp.float32
    assert jnp.allclose(out, ref, atol=1e-5, rtol=1e-5), "mismatch (no layer norm)"

    # Path 2: masked layer norm, row count chosen so both kernels hit a partial
    # last block (rows = 5*126 = 630, not a multiple of the 512-row tile).
    B2, T2 = 5, 126
    tensors2 = [jax.random.normal(keys[N + i], (B2, T2, D), jnp.float32) for i in range(N)]
    mask2 = (jax.random.uniform(keys[2 * N], (B2, T2)) > 0.2).astype(jnp.float32)
    mix_ln = ScalarMixWithDropout(N, do_layer_norm=True, initial_scalar_parameters=init)
    out_ln = mix_ln(tensors2, mask=mask2)
    jax.block_until_ready(out_ln)
    ref_ln = reference_forward(tensors2, mix_ln.scalar_parameters, mix_ln.gamma, True, mask2)
    assert out_ln.shape == (B2, T2, D)
    assert jnp.allclose(out_ln, ref_ln, atol=1e-4, rtol=1e-4), "mismatch (layer norm)"

    print("KERNEL_OK")
</pallas_src>

<mosaic_0001>
module attributes {stable_mosaic.version = 11 : i64} {
  func.func @_mix_kernel(%arg0: i32, %arg1: memref<4xf32, #tpu.memory_space<smem>>, %arg2: memref<1xf32, #tpu.memory_space<smem>>, %arg3: memref<1x512xf32, #tpu.memory_space<vmem>>, %arg4: memref<1x512xf32, #tpu.memory_space<vmem>>, %arg5: memref<1x512xf32, #tpu.memory_space<vmem>>, %arg6: memref<1x512xf32, #tpu.memory_space<vmem>>, %arg7: memref<1x512xf32, #tpu.memory_space<vmem>>) attributes {dimension_semantics = [#tpu.dimension_semantics<parallel>], iteration_bounds = array<i64: 1>, scalar_prefetch = 0 : i64, scratch_operands = 0 : i64, tpu.core_type = #tpu.core_type<tc>, window_params = [{transform_indices = @transform_0, window_bounds = array<i64: 4>}, {transform_indices = @transform_1, window_bounds = array<i64: 1>}, {transform_indices = @transform_2, window_bounds = array<i64: 1, 512>}, {transform_indices = @transform_3, window_bounds = array<i64: 1, 512>}, {transform_indices = @transform_4, window_bounds = array<i64: 1, 512>}, {transform_indices = @transform_5, window_bounds = array<i64: 1, 512>}, {transform_indices = @transform_6, window_bounds = array<i64: 1, 512>}]} {
    %c0 = arith.constant 0 : index
    %0 = memref.load %arg1[%c0] : memref<4xf32, #tpu.memory_space<smem>>
    %c0_0 = arith.constant 0 : index
    %c0_1 = arith.constant 0 : index
    %1 = vector.load %arg3[%c0_0, %c0_1] : memref<1x512xf32, #tpu.memory_space<vmem>>, vector<1x512xf32>
    %2 = vector.broadcast %0 : f32 to vector<1x512xf32>
    %3 = arith.mulf %2, %1 : vector<1x512xf32>
    %c0_2 = arith.constant 0 : index
    %4 = memref.load %arg2[%c0_2] : memref<1xf32, #tpu.memory_space<smem>>
    %5 = vector.broadcast %4 : f32 to vector<1x512xf32>
    %6 = arith.addf %3, %5 : vector<1x512xf32>
    %c1 = arith.constant 1 : index
    %7 = memref.load %arg1[%c1] : memref<4xf32, #tpu.memory_space<smem>>
    %c0_3 = arith.constant 0 : index
    %c0_4 = arith.constant 0 : index
    %8 = vector.load %arg4[%c0_3, %c0_4] : memref<1x512xf32, #tpu.memory_space<vmem>>, vector<1x512xf32>
    %9 = vector.broadcast %7 : f32 to vector<1x512xf32>
    %10 = arith.mulf %9, %8 : vector<1x512xf32>
    %11 = arith.addf %6, %10 : vector<1x512xf32>
    %c2 = arith.constant 2 : index
    %12 = memref.load %arg1[%c2] : memref<4xf32, #tpu.memory_space<smem>>
    %c0_5 = arith.constant 0 : index
    %c0_6 = arith.constant 0 : index
    %13 = vector.load %arg5[%c0_5, %c0_6] : memref<1x512xf32, #tpu.memory_space<vmem>>, vector<1x512xf32>
    %14 = vector.broadcast %12 : f32 to vector<1x512xf32>
    %15 = arith.mulf %14, %13 : vector<1x512xf32>
    %16 = arith.addf %11, %15 : vector<1x512xf32>
    %c3 = arith.constant 3 : index
    %17 = memref.load %arg1[%c3] : memref<4xf32, #tpu.memory_space<smem>>
    %c0_7 = arith.constant 0 : index
    %c0_8 = arith.constant 0 : index
    %18 = vector.load %arg6[%c0_7, %c0_8] : memref<1x512xf32, #tpu.memory_space<vmem>>, vector<1x512xf32>
    %19 = vector.broadcast %17 : f32 to vector<1x512xf32>
    %20 = arith.mulf %19, %18 : vector<1x512xf32>
    %21 = arith.addf %16, %20 : vector<1x512xf32>
    %c0_9 = arith.constant 0 : index
    %c0_10 = arith.constant 0 : index
    %22 = vector.load %arg7[%c0_9, %c0_10] : memref<1x512xf32, #tpu.memory_space<vmem>>, vector<1x512xf32>
    tpu.vector_store %arg7[%c0_9, %c0_10], %21 {strides = array<i32>} : memref<1x512xf32, #tpu.memory_space<vmem>>, vector<1x512xf32>,
    return
  }
  func.func @transform_0(%arg0: i32) -> i32 {
    %c0_i32 = arith.constant 0 : i32
    %c0_i32_0 = arith.constant 0 : i32
    return %c0_i32 : i32
  }
  func.func @transform_1(%arg0: i32) -> i32 {
    %c0_i32 = arith.constant 0 : i32
    %c0_i32_0 = arith.constant 0 : i32
    return %c0_i32 : i32
  }
  func.func @transform_2(%arg0: i32) -> (i32, i32) {
    %c0_i32 = arith.constant 0 : i32
    %c0_i32_0 = arith.constant 0 : i32
    return %arg0, %c0_i32 : i32, i32
  }
  func.func @transform_3(%arg0: i32) -> (i32, i32) {
    %c0_i32 = arith.constant 0 : i32
    %c0_i32_0 = arith.constant 0 : i32
    return %arg0, %c0_i32 : i32, i32
  }
  func.func @transform_4(%arg0: i32) -> (i32, i32) {
    %c0_i32 = arith.constant 0 : i32
    %c0_i32_0 = arith.constant 0 : i32
    return %arg0, %c0_i32 : i32, i32
  }
  func.func @transform_5(%arg0: i32) -> (i32, i32) {
    %c0_i32 = arith.constant 0 : i32
    %c0_i32_0 = arith.constant 0 : i32
    return %arg0, %c0_i32 : i32, i32
  }
  func.func @transform_6(%arg0: i32) -> (i32, i32) {
    %c0_i32 = arith.constant 0 : i32
    %c0_i32_0 = arith.constant 0 : i32
    return %arg0, %c0_i32 : i32, i32
  }
}

</mosaic_0001>

<bundles_post_ra>
// kernel: tpu_custom_call.1
= control target key start
LH: loop header
LB: loop body
LE: loop exit
PB: predicated region body
PF: predicated region fallthrough
CT: control target
= control target key end

     0   :  { %12 = vsyncpa [#allocation6], 0  ;;  %s310_s0 = inlined_call_operand.hbm [shape: f32[4], index: 0, kind: input, shape index: {}]   ;;  %s311_s1 = inlined_call_operand.<no memory space> [shape: f32[1], index: 1, kind: input, shape index: {}]   ;;  %s312_s2 = inlined_call_operand.hbm [shape: f32[1,512], index: 2, kind: input, shape index: {}]   ;;  %s313_s3 = inlined_call_operand.hbm [shape: f32[1,512], index: 3, kind: input, shape index: {}]   ;;  %s314_s4 = inlined_call_operand.vmem [shape: f32[1,512], index: 4, kind: input, shape index: {}]   ;;  %s315_s5 = inlined_call_operand.hbm [shape: f32[1,512], index: 5, kind: input, shape index: {}]   ;;  %s316_s6 = inlined_call_operand.hbm [shape: f32[1,512], index: 6, kind: output, shape index: {}]  }
   0x1   :  { %13 = vsyncpa [#allocation4], 0 }
   0x2   :  { %14 = vsyncpa [#allocation9], 0  ;;  %s43_s23 = sshll.u32 %s313_s3, 4  ;;  %s44_s23 = int_to_ptr.hbm [resolvable:$true] %s43_s23 }
   0x3   :  { %15 = vsyncpa [#allocation5], 0  ;;  %s249_s24 = smov [#allocation8]   ;;  %s21_s28 = sshll.u32 %s310_s0, 4  ;;  %s22_s28 = int_to_ptr.hbm [resolvable:$true] %s21_s28 }
   0x4   :  { %s45_s25 = sshll.u32 %s249_s24, 4  ;;  %s250_s29 = smov [#allocation3]   ;;  %s46_s25 = int_to_ptr.vmem [resolvable:$true] %s45_s25 }
   0x5   :  { %48 = dma.hbm_to_vmem [thread:$0]  %s44_s23, 64, %s46_s25, [#allocation9]  }
   0x6   :  { %24 = dma.hbm_to_smem %s22_s28, 16, %s250_s29, [#allocation6]  }
   0x7   :  { %s32_s8 = sshll.u32 %s312_s2, 4  ;;  %s251_s9 = smov [#allocation7]   ;;  %s33_s8 = int_to_ptr.hbm [resolvable:$true] %s32_s8 }
   0x8   :  { %s34_s3 = sshll.u32 %s251_s9, 4  ;;  %s56_s12 = sshll.u32 %s315_s5, 4  ;;  %s35_s3 = int_to_ptr.vmem [resolvable:$true] %s34_s3  ;;  %s57_s12 = int_to_ptr.hbm [resolvable:$true] %s56_s12 }
   0x9   :  { %37 = dma.hbm_to_vmem [thread:$0]  %s33_s8, 64, %s35_s3, [#allocation4]  }
   0xa   :  { %s252_s13 = smov [#allocation10]  }
   0xb   :  { %s58_s0 = sshll.u32 %s252_s13, 4  ;;  %s59_s0 = int_to_ptr.vmem [resolvable:$true] %s58_s0 }
   0xc   :  { %61 = dma.hbm_to_vmem [thread:$0]  %s57_s12, 64, %s59_s0, [#allocation9]  }
   0xd   :  { %241 = dma.done.wait [#allocation6], 16  }
   0xe   :  { %242 = vsyncadd [#allocation6], 4294967280 }
   0xf   :  { %243 = dma.done.wait [#allocation4], 64  }
  0x10   :  { %244 = vsyncadd [#allocation4], 4294967232 }
  0x11   :  { %245 = dma.done.wait [#allocation9], 128  }
  0x12   :  { %246 = vsyncadd [#allocation9], 4294967168 }
  0x13   :  { %78 = sfence }
  0x14   :  { %s79_s2 = sld [smem:[#allocation3]]  ;;  %v80_v0 = vld [vmem:[#allocation7] sm:$0xf]  ;;  %v87_v1 = vld [vmem:[#allocation8] sm:$0xf]  ;;  %v84_v3 = vstv %s311_s1  ;;  %v101_v13 = vlaneseq  ;;  %s253_s20 = smov [#allocation11]  }
  0x15   :  { %s125_s14 = sld [smem:[#allocation3 + $0x1]]  ;;  %v92_v4 = vld [vmem:[%s314_s4] sm:$0xf]  ;;  %v97_v9 = vld [vmem:[#allocation10] sm:$0xf]  ;;  %s111_s21 = sshll.u32 %s253_s20, 4  ;;  %s112_s21 = int_to_ptr.vmem [resolvable:$true] %s111_s21 }
  0x16   :  { %s126_s15 = sld [smem:[#allocation3 + $0x2]]  ;;  %s113_s1 = sshll.u32 %s316_s6, 4  ;;  %vm103_vm0 = vcmp.lt.s32.totalorder %v101_v13, 512  ;;  %s114_s1 = int_to_ptr.hbm [resolvable:$true] %s113_s1 }
  0x17   :  { %s127_s16 = sld [smem:[#allocation3 + $0x3]] }
  0x1a   :  { %v81_v2 = vstv %s79_s2 }
  0x1b   :  { %v82_v5 = vmul.f32 %v81_v2, %v80_v0  ;;  %v88_v6 = vstv %s125_s14 }
  0x1c   :  { %v89_v7 = vmul.f32 %v88_v6, %v87_v1  ;;  %v93_v8 = vstv %s126_s15 }
  0x1d   :  { %v85_v10 = vadd.f32 %v84_v3, %v82_v5  ;;  %v94_v11 = vmul.f32 %v93_v8, %v92_v4  ;;  %v98_v12 = vstv %s127_s16 }
  0x1e   :  { %v99_v15 = vmul.f32 %v98_v12, %v97_v9 }
  0x1f   :  { %v90_v14 = vadd.f32 %v89_v7, %v85_v10 }
  0x21   :  { %v95_v16 = vadd.f32 %v94_v11, %v90_v14 }
  0x23   :  { %v100_v17 = vadd.f32 %v99_v15, %v95_v16 }
  0x25   :  { %105 = vst.msk [vmem:[#allocation11] sm:$0xf] %vm103_vm0, %v100_v17 }
  0x26   :  { %116 = dma.vmem_to_hbm [thread:$0]  %s112_s21, 64, %s114_s1, [#allocation5]  }
  0x27   :  { %247 = dma.done.wait [#allocation5], 64  }
  0x28   :  { %248 = vsyncadd [#allocation5], 4294967232 }
  0x29   :  { %121 = vsyncpa [#allocation4], 1 }
  0x2a   :  { %122 = vsyncpa [#allocation9], 1 }
  0x2b   :  { %123 = vsyncpa [#allocation5], 1 }
  0x2c   :  { %124 = vsyncpa [#allocation6], 1 }

</bundles_post_ra>
